<compile_context>
chip_gen: v7x
topology: tpu7x:2x2x1
jax: 0.10.0
libtpu: 0.0.40
codegen_flags: <defaults>
</compile_context>

<pallas_src>
import numpy as np
import jax
import jax.numpy as jnp
from jax.experimental import pallas as pl
from jax.experimental.pallas import tpu as pltpu

KSIZE = 4                      # Conv1d kernel size in the reference module
MM_DTYPE = jnp.bfloat16        # matmul operand dtype (accumulation stays f32)


def _round_up(x, m):
    return ((x + m - 1) // m) * m


# ---------------------------------------------------------------------------
# Pallas kernel: 2 MXU matmuls + f32 epilogues + VPU/XLU output reduction.
# ---------------------------------------------------------------------------
def _critic_kernel(x_ref, wb_ref, bb_ref, wfc_ref, tail_ref, o_ref):
    # Fused branch layer: scalar FCs + convs in one matmul against the raw
    # flattened state; biases added in f32 (never quantized to bf16).
    x = x_ref[...].astype(MM_DTYPE)                          # [Mt, Kin]
    branch = jnp.maximum(
        jnp.dot(x, wb_ref[...], preferred_element_type=jnp.float32)
        + bb_ref[...], 0.0
    )                                                        # [Mt, Nb] f32

    # fullyConnected: single K=Nb matmul, f32 bias + ReLU epilogue.
    h = jnp.maximum(
        jnp.dot(branch.astype(MM_DTYPE), wfc_ref[...],
                preferred_element_type=jnp.float32)
        + tail_ref[0:1, :], 0.0
    )                                                        # [Mt, Nf] f32

    # outputLayer (N=1): VPU multiply + lane reduction instead of an MXU pass.
    w_out = tail_ref[1:2, :]                                 # [1, Nf]
    b_out = tail_ref[2:3, 0:1]                               # [1, 1]
    o_ref[...] = jnp.sum(h * w_out, axis=-1, keepdims=True) + b_out


# ---------------------------------------------------------------------------
# Parameter construction (matches the PyTorch init scheme).
# ---------------------------------------------------------------------------
def _xavier_uniform(key, shape, fan_in, fan_out):
    a = float(np.sqrt(6.0 / (fan_in + fan_out)))
    return jax.random.uniform(key, shape, jnp.float32, -a, a)


def _xavier_normal(key, shape, fan_in, fan_out):
    std = float(np.sqrt(2.0 / (fan_in + fan_out)))
    return std * jax.random.normal(key, shape, jnp.float32)


def make_params(state_dim, a_dim, n_conv, n_fc, n_fc1, key):
    S0, S1 = state_dim
    ks = jax.random.split(key, 9)
    num_fc_in = (2 * n_conv * (S1 - KSIZE + 1) + 3 * n_fc
                 + n_conv * (a_dim - KSIZE + 1))
    p = {
        "bitrateFc_w": _xavier_uniform(ks[0], (n_fc, 1), 1, n_fc),
        "bitrateFc_b": jnp.zeros((n_fc,), jnp.float32),
        "bufferFc_w": _xavier_uniform(ks[1], (n_fc, 1), 1, n_fc),
        "bufferFc_b": jnp.zeros((n_fc,), jnp.float32),
        "leftChunkFc_w": _xavier_uniform(ks[2], (n_fc, 1), 1, n_fc),
        "leftChunkFc_b": jnp.zeros((n_fc,), jnp.float32),
        "tConv_w": _xavier_uniform(ks[3], (n_conv, 1, KSIZE), KSIZE, n_conv * KSIZE),
        "tConv_b": jnp.zeros((n_conv,), jnp.float32),
        "dConv_w": _xavier_uniform(ks[4], (n_conv, 1, KSIZE), KSIZE, n_conv * KSIZE),
        "dConv_b": jnp.zeros((n_conv,), jnp.float32),
        "cConv_w": _xavier_normal(ks[5], (n_conv, 1, KSIZE), KSIZE, n_conv * KSIZE),
        "cConv_b": jnp.zeros((n_conv,), jnp.float32),
        "fc_w": _xavier_uniform(ks[6], (n_fc1, num_fc_in), num_fc_in, n_fc1),
        "fc_b": jnp.zeros((n_fc1,), jnp.float32),
    }
    bound = float(1.0 / np.sqrt(n_fc1))
    p["out_w"] = jax.random.uniform(ks[7], (1, n_fc1), jnp.float32, -bound, bound)
    p["out_b"] = jax.random.uniform(ks[8], (1,), jnp.float32, -bound, bound)
    return p


# ---------------------------------------------------------------------------
# One-time host-side packing (NOT on the per-call path).
# ---------------------------------------------------------------------------
def _toeplitz(w, length):
    """Conv1d(1, C, K) -> [length, C*Lout] matrix, columns in PyTorch
    .view(B, -1) flatten order (col = c * Lout + p)."""
    w = np.asarray(w)
    C, _, K = w.shape
    Lout = length - K + 1
    T = np.zeros((length, C * Lout), np.float32)
    for c in range(C):
        for p in range(Lout):
            T[p:p + K, c * Lout + p] = w[c, 0, :]
    return T


def pack_params(params, state_dim, a_dim, n_conv, n_fc, n_fc1):
    S0, S1 = state_dim
    if S1 < KSIZE or a_dim < KSIZE:
        raise ValueError("state history length and a_dim must be >= conv kernel "
                         f"size ({KSIZE}); got S1={S1}, a_dim={a_dim}")
    Lt = S1 - KSIZE + 1
    Lc = a_dim - KSIZE + 1
    num_fc_in = 2 * n_conv * Lt + 3 * n_fc + n_conv * Lc
    Kin = S0 * S1                          # raw flattened state width
    Nb = _round_up(num_fc_in, 128)         # lane-padded branch width / fc K dim
    Nf = _round_up(n_fc1, 128)             # lane-padded fc output width

    # Row offsets in the RAW flattened state (row = channel * S1 + position);
    # unused history entries map to zero rows of Wb -> no concat on the call path.
    r_bit = 0 * S1 + (S1 - 1)
    r_buf = 1 * S1 + (S1 - 1)
    r_t = 2 * S1
    r_d = 3 * S1
    r_c = 4 * S1
    r_left = 5 * S1 + (S1 - 1)
    # Column offsets (PyTorch torch.cat order): [bit, buf, t, d, c, left]
    c_bit = 0
    c_buf = n_fc
    c_t = 2 * n_fc
    c_d = c_t + n_conv * Lt
    c_c = c_d + n_conv * Lt
    c_left = c_c + n_conv * Lc

    Wb = np.zeros((Kin, Nb), np.float32)
    Wb[r_bit, c_bit:c_bit + n_fc] = np.asarray(params["bitrateFc_w"])[:, 0]
    Wb[r_buf, c_buf:c_buf + n_fc] = np.asarray(params["bufferFc_w"])[:, 0]
    Wb[r_t:r_t + S1, c_t:c_t + n_conv * Lt] = _toeplitz(params["tConv_w"], S1)
    Wb[r_d:r_d + S1, c_d:c_d + n_conv * Lt] = _toeplitz(params["dConv_w"], S1)
    Wb[r_c:r_c + a_dim, c_c:c_c + n_conv * Lc] = _toeplitz(params["cConv_w"], a_dim)
    Wb[r_left, c_left:c_left + n_fc] = np.asarray(params["leftChunkFc_w"])[:, 0]

    # Branch biases stay f32 and are added in the kernel epilogue (never bf16).
    bb = np.zeros((1, Nb), np.float32)
    bb[0, c_bit:c_bit + n_fc] = np.asarray(params["bitrateFc_b"])
    bb[0, c_buf:c_buf + n_fc] = np.asarray(params["bufferFc_b"])
    bb[0, c_t:c_t + n_conv * Lt] = np.repeat(np.asarray(params["tConv_b"]), Lt)
    bb[0, c_d:c_d + n_conv * Lt] = np.repeat(np.asarray(params["dConv_b"]), Lt)
    bb[0, c_c:c_c + n_conv * Lc] = np.repeat(np.asarray(params["cConv_b"]), Lc)
    bb[0, c_left:c_left + n_fc] = np.asarray(params["leftChunkFc_b"])

    # Padded rows (Nb > num_fc_in) are zero in both Wfc and the ReLU'd branch
    # output, padded cols (Nf > n_fc1) are zero in Wfc / fc_b / out_w -> exact.
    Wfc = np.zeros((Nb, Nf), np.float32)
    Wfc[:num_fc_in, :n_fc1] = np.asarray(params["fc_w"]).T

    tail = np.zeros((3, Nf), np.float32)                     # f32 epilogue params
    tail[0, :n_fc1] = np.asarray(params["fc_b"])
    tail[1, :n_fc1] = np.asarray(params["out_w"])[0, :]
    tail[2, 0] = float(np.asarray(params["out_b"])[0])

    return {
        "w_branch": jnp.asarray(Wb, dtype=MM_DTYPE),
        "b_branch": jnp.asarray(bb, dtype=jnp.float32),
        "w_fc": jnp.asarray(Wfc, dtype=MM_DTYPE),
        "tail": jnp.asarray(tail, dtype=jnp.float32),
    }


# ---------------------------------------------------------------------------
# Per-call path: reshape (metadata-only) + one pallas_call.
# ---------------------------------------------------------------------------
def critic_forward(packed, inputs, *, block_b=512):
    """inputs: [B, S0, S1] f32 state tensor.  block_b: batch tile (multiple of
    256 feeds the 2x256^2 MXU at full depth on v6e/v7x; multiple of 128 is
    enough on v5e).  VMEM is not a constraint on any generation at these sizes."""
    B, S0, S1 = inputs.shape
    Kin = S0 * S1
    x = inputs.reshape(B, Kin)            # metadata-only; no concat, no copy

    if B <= block_b:
        Mt, Bp = B, B                     # single tile equal to the full batch
    else:
        Mt = block_b
        Bp = _round_up(B, Mt)
        if Bp != B:
            x = jnp.pad(x, ((0, Bp - B), (0, 0)))

    Nb = packed["w_branch"].shape[1]
    Nf = packed["w_fc"].shape[1]

    out = pl.pallas_call(
        _critic_kernel,
        out_shape=jax.ShapeDtypeStruct((Bp, 1), jnp.float32),
        grid=(Bp // Mt,),
        in_specs=[
            # Batch-tiled input; weights use constant index_maps so they are
            # DMAed once and stay resident in VMEM across grid steps.
            pl.BlockSpec((Mt, Kin), lambda i: (i, 0)),
            pl.BlockSpec((Kin, Nb), lambda i: (0, 0)),
            pl.BlockSpec((1, Nb), lambda i: (0, 0)),
            pl.BlockSpec((Nb, Nf), lambda i: (0, 0)),
            pl.BlockSpec((3, Nf), lambda i: (0, 0)),
        ],
        out_specs=pl.BlockSpec((Mt, 1), lambda i: (i, 0)),
        compiler_params=pltpu.CompilerParams(
            # Parallel batch axis: shards grid steps across both TensorCores on
            # v7x; no-op on v5e/v6e (single TC).
            dimension_semantics=("parallel",)),
    )(x, packed["w_branch"], packed["b_branch"], packed["w_fc"], packed["tail"])

    return out[:B] if Bp != B else out


# ---------------------------------------------------------------------------
# Pure-JAX reference of the PyTorch forward (correctness check only).
# ---------------------------------------------------------------------------
def critic_reference(params, inputs, a_dim):
    relu = lambda v: jnp.maximum(v, 0.0)
    lin = lambda x, w, b: x @ w.T + b

    def conv1d(x, w, b):  # x [B, L], w [C,1,K], b [C]
        y = jax.lax.conv_general_dilated(
            x[:, None, :], w, (1,), "VALID",
            dimension_numbers=("NCH", "OIH", "NCH"))
        return relu(y + b[None, :, None])

    B = inputs.shape[0]
    bit = relu(lin(inputs[:, 0, -1:], params["bitrateFc_w"], params["bitrateFc_b"]))
    buf = relu(lin(inputs[:, 1, -1:], params["bufferFc_w"], params["bufferFc_b"]))
    left = relu(lin(inputs[:, 5, -1:], params["leftChunkFc_w"], params["leftChunkFc_b"]))
    t = conv1d(inputs[:, 2, :], params["tConv_w"], params["tConv_b"]).reshape(B, -1)
    d = conv1d(inputs[:, 3, :], params["dConv_w"], params["dConv_b"]).reshape(B, -1)
    c = conv1d(inputs[:, 4, :a_dim], params["cConv_w"], params["cConv_b"]).reshape(B, -1)
    cat = jnp.concatenate([bit, buf, t, d, c, left], axis=1)
    h = relu(lin(cat, params["fc_w"], params["fc_b"]))
    return lin(h, params["out_w"], params["out_b"])


if __name__ == "__main__":
    state_dim = (6, 8)        # (state channels, history length)
    a_dim = 6                 # number of bitrate actions
    n_conv, n_fc, n_fc1 = 16, 16, 32
    B = 2

    key = jax.random.PRNGKey(0)
    k_in, k_par = jax.random.split(key)
    inputs = jax.random.normal(k_in, (B,) + state_dim, dtype=jnp.float32)

    params = make_params(state_dim, a_dim, n_conv, n_fc, n_fc1, k_par)
    packed = pack_params(params, state_dim, a_dim, n_conv, n_fc, n_fc1)  # once

    fwd = jax.jit(critic_forward)
    out = jax.block_until_ready(fwd(packed, inputs))

    ref = critic_reference(params, inputs, a_dim)
    # Tolerance covers bf16 matmul operands (f32 accumulation, f32 bias/ReLU
    # epilogues, f32 output reduction). NOTE: weights/activations are quantized
    # to bf16 by design; acceptable for an RL critic.
    tol = 3e-2 if MM_DTYPE == jnp.bfloat16 else 1e-5
    np.testing.assert_allclose(np.asarray(out), np.asarray(ref), rtol=tol, atol=tol)
    print("KERNEL_OK")
</pallas_src>

<mosaic_0001>
module attributes {stable_mosaic.version = 11 : i64} {
  func.func @_critic_kernel(%arg0: i32, %arg1: memref<2x48xf32, #tpu.memory_space<vmem>>, %arg2: memref<48x256xbf16, #tpu.memory_space<vmem>>, %arg3: memref<1x256xf32, #tpu.memory_space<vmem>>, %arg4: memref<256x128xbf16, #tpu.memory_space<vmem>>, %arg5: memref<3x128xf32, #tpu.memory_space<vmem>>, %arg6: memref<2x1xf32, #tpu.memory_space<vmem>>) attributes {dimension_semantics = [#tpu.dimension_semantics<parallel>], iteration_bounds = array<i64: 1>, scalar_prefetch = 0 : i64, scratch_operands = 0 : i64, tpu.core_type = #tpu.core_type<tc>, window_params = [{transform_indices = @transform_0, window_bounds = array<i64: 2, 48>}, {pipeline_mode = #tpu.pipeline_mode<synchronous>, transform_indices = @transform_1, window_bounds = array<i64: 48, 256>}, {pipeline_mode = #tpu.pipeline_mode<synchronous>, transform_indices = @transform_2, window_bounds = array<i64: 1, 256>}, {pipeline_mode = #tpu.pipeline_mode<synchronous>, transform_indices = @transform_3, window_bounds = array<i64: 256, 128>}, {pipeline_mode = #tpu.pipeline_mode<synchronous>, transform_indices = @transform_4, window_bounds = array<i64: 3, 128>}, {transform_indices = @transform_5, window_bounds = array<i64: 2, 1>}]} {
    %c0 = arith.constant 0 : index
    %c0_0 = arith.constant 0 : index
    %0 = vector.load %arg1[%c0, %c0_0] : memref<2x48xf32, #tpu.memory_space<vmem>>, vector<2x48xf32>
    %1 = arith.truncf %0 : vector<2x48xf32> to vector<2x48xbf16>
    %c0_1 = arith.constant 0 : index
    %c0_2 = arith.constant 0 : index
    %2 = vector.load %arg2[%c0_1, %c0_2] : memref<48x256xbf16, #tpu.memory_space<vmem>>, vector<48x256xbf16>
    %cst = arith.constant dense<0.000000e+00> : vector<2x256xf32>
    %3 = tpu.matmul %1, %2, %cst {dimension_numbers = #tpu.dot_dimension_numbers<[1], [0], [0], [1], [0, 0, 1, 1], [], []>} : vector<2x48xbf16>, vector<48x256xbf16>, vector<2x256xf32> -> vector<2x256xf32>
    %c0_3 = arith.constant 0 : index
    %c0_4 = arith.constant 0 : index
    %4 = vector.load %arg3[%c0_3, %c0_4] : memref<1x256xf32, #tpu.memory_space<vmem>>, vector<1x256xf32>
    %5 = vector.broadcast %4 : vector<1x256xf32> to vector<2x256xf32>
    %6 = arith.addf %3, %5 : vector<2x256xf32>
    %cst_5 = arith.constant 0.000000e+00 : f32
    %7 = vector.broadcast %cst_5 : f32 to vector<2x256xf32>
    %8 = arith.maximumf %6, %7 : vector<2x256xf32>
    %9 = arith.truncf %8 : vector<2x256xf32> to vector<2x256xbf16>
    %c0_6 = arith.constant 0 : index
    %c0_7 = arith.constant 0 : index
    %10 = vector.load %arg4[%c0_6, %c0_7] : memref<256x128xbf16, #tpu.memory_space<vmem>>, vector<256x128xbf16>
    %cst_8 = arith.constant dense<0.000000e+00> : vector<2x128xf32>
    %11 = tpu.matmul %9, %10, %cst_8 {dimension_numbers = #tpu.dot_dimension_numbers<[1], [0], [0], [1], [0, 0, 1, 1], [], []>} : vector<2x256xbf16>, vector<256x128xbf16>, vector<2x128xf32> -> vector<2x128xf32>
    %c0_9 = arith.constant 0 : index
    %c0_10 = arith.constant 0 : index
    %12 = vector.load %arg5[%c0_9, %c0_10] : memref<3x128xf32, #tpu.memory_space<vmem>>, vector<1x128xf32>
    %13 = vector.broadcast %12 : vector<1x128xf32> to vector<2x128xf32>
    %14 = arith.addf %11, %13 : vector<2x128xf32>
    %cst_11 = arith.constant 0.000000e+00 : f32
    %15 = vector.broadcast %cst_11 : f32 to vector<2x128xf32>
    %16 = arith.maximumf %14, %15 : vector<2x128xf32>
    %c1 = arith.constant 1 : index
    %c0_12 = arith.constant 0 : index
    %17 = vector.load %arg5[%c1, %c0_12] : memref<3x128xf32, #tpu.memory_space<vmem>>, vector<1x128xf32>
    %c2 = arith.constant 2 : index
    %c0_13 = arith.constant 0 : index
    %18 = vector.load %arg5[%c2, %c0_13] : memref<3x128xf32, #tpu.memory_space<vmem>>, vector<1x1xf32>
    %19 = vector.broadcast %17 : vector<1x128xf32> to vector<2x128xf32>
    %20 = arith.mulf %16, %19 : vector<2x128xf32>
    %cst_14 = arith.constant dense<0.000000e+00> : vector<2xf32>
    %21 = vector.multi_reduction <add>, %20, %cst_14 [1] : vector<2x128xf32> to vector<2xf32>
    %22 = vector.shape_cast %21 : vector<2xf32> to vector<2x1xf32>
    %23 = vector.broadcast %18 : vector<1x1xf32> to vector<2x1xf32>
    %24 = arith.addf %22, %23 : vector<2x1xf32>
    %c0_15 = arith.constant 0 : index
    %c0_16 = arith.constant 0 : index
    %25 = vector.load %arg6[%c0_15, %c0_16] : memref<2x1xf32, #tpu.memory_space<vmem>>, vector<2x1xf32>
    tpu.vector_store %arg6[%c0_15, %c0_16], %24 {strides = array<i32>} : memref<2x1xf32, #tpu.memory_space<vmem>>, vector<2x1xf32>,
    return
  }
  func.func @transform_0(%arg0: i32) -> (i32, i32) {
    %c0_i32 = arith.constant 0 : i32
    %c0_i32_0 = arith.constant 0 : i32
    return %arg0, %c0_i32 : i32, i32
  }
  func.func @transform_1(%arg0: i32) -> (i32, i32) {
    %c0_i32 = arith.constant 0 : i32
    %c0_i32_0 = arith.constant 0 : i32
    %c0_i32_1 = arith.constant 0 : i32
    return %c0_i32, %c0_i32_0 : i32, i32
  }
  func.func @transform_2(%arg0: i32) -> (i32, i32) {
    %c0_i32 = arith.constant 0 : i32
    %c0_i32_0 = arith.constant 0 : i32
    %c0_i32_1 = arith.constant 0 : i32
    return %c0_i32, %c0_i32_0 : i32, i32
  }
  func.func @transform_3(%arg0: i32) -> (i32, i32) {
    %c0_i32 = arith.constant 0 : i32
    %c0_i32_0 = arith.constant 0 : i32
    %c0_i32_1 = arith.constant 0 : i32
    return %c0_i32, %c0_i32_0 : i32, i32
  }
  func.func @transform_4(%arg0: i32) -> (i32, i32) {
    %c0_i32 = arith.constant 0 : i32
    %c0_i32_0 = arith.constant 0 : i32
    %c0_i32_1 = arith.constant 0 : i32
    return %c0_i32, %c0_i32_0 : i32, i32
  }
  func.func @transform_5(%arg0: i32) -> (i32, i32) {
    %c0_i32 = arith.constant 0 : i32
    %c0_i32_0 = arith.constant 0 : i32
    return %arg0, %c0_i32 : i32, i32
  }
}

</mosaic_0001>

<bundles_post_ra>
// kernel: critic_forward.1
= control target key start
LH: loop header
LB: loop body
LE: loop exit
PB: predicated region body
PF: predicated region fallthrough
CT: control target
= control target key end

     0   :  { %10 = vsyncpa [#allocation3], 0  ;;  %s600_s0 = inlined_call_operand.vmem [shape: f32[2,48], index: 0, kind: input, shape index: {}]   ;;  %s601_s1 = inlined_call_operand.vmem [shape: bf16[48,256], index: 1, kind: input, shape index: {}]   ;;  %s602_s2 = inlined_call_operand.hbm [shape: f32[1,256], index: 2, kind: input, shape index: {}]   ;;  %s603_s3 = inlined_call_operand.hbm [shape: bf16[256,128], index: 3, kind: input, shape index: {}]   ;;  %s604_s4 = inlined_call_operand.hbm [shape: f32[3,128], index: 4, kind: input, shape index: {}]   ;;  %s605_s5 = inlined_call_operand.vmem [shape: f32[2,1], index: 5, kind: output, shape index: {}]  }
   0x1   :  { %11 = vsyncpa [#allocation5], 0  ;;  %s504_s18 = smov [#allocation4]   ;;  %s434_s22 = scalar_lea.hbm %s603_s3, 2048 }
   0x2   :  { %s31_s19 = sshll.u32 %s504_s18, 4  ;;  %p435_p0 = scmp.ne.s32.totalorder %s603_s3, %s434_s22  ;;  %s32_s19 = int_to_ptr.vmem [resolvable:$true] %s31_s19 }
   0x3   :  { %p438_p1 = scmp.lt.u32.totalorder %s434_s22, %s603_s3 }
   0x5   :  { %p440_p2 = pnand %p438_p1, %p435_p0 }
   0x7   :  { %443 = shalt.err (!%p440_p2)
}
   0x8   :  { %s444_s27 = scalar_lea.vmem %s32_s19, 2048  ;;  %p449_p4 = scmp.lt.s32.totalorder %s32_s19, %s32_s19 }
   0x9   :  { %p445_p3 = scmp.ne.s32.totalorder %s32_s19, %s444_s27  ;;  %p450_p5 = scmp.lt.s32.totalorder %s444_s27, %s444_s27 }
   0xb   :  { %p451_p6 = por %p450_p5, %p449_p4 }
   0xd   :  { %p452_p7 = pnand %p451_p6, %p445_p3 }
   0xf   :  { %455 = shalt.err (!%p452_p7)
}
  0x10   :  { %s505_s28 = smov 64   ;;  %s506_s29 = smov 4  }
  0x11   :  { %37 = dma.hbm_to_vmem [thread:$0]  %s603_s3, 2048, %s32_s19, [#allocation5], %s505_s28, %s505_s28, %s506_s29  }
  0x12   :  { %s507_s7 = smov [#allocation2]   ;;  %s508_s9 = smov [#allocation6]  }
  0x13   :  { %s22_s8 = sshll.u32 %s507_s7, 4  ;;  %s44_s10 = sshll.u32 %s508_s9, 4  ;;  %s23_s8 = int_to_ptr.vmem [resolvable:$true] %s22_s8  ;;  %s45_s10 = int_to_ptr.vmem [resolvable:$true] %s44_s10 }
  0x14   :  { %s456_s13 = scalar_lea.hbm %s602_s2, 32 }
  0x15   :  { %p457_p8 = scmp.ne.s32.totalorder %s602_s2, %s456_s13  ;;  %p460_p9 = scmp.lt.u32.totalorder %s456_s13, %s602_s2 }
  0x17   :  { %p462_p10 = pnand %p460_p9, %p457_p8 }
  0x19   :  { %465 = shalt.err (!%p462_p10)
}
  0x1a   :  { %s466_s3 = scalar_lea.vmem %s23_s8, 32  ;;  %p471_p12 = scmp.lt.s32.totalorder %s23_s8, %s23_s8 }
  0x1b   :  { %p467_p11 = scmp.ne.s32.totalorder %s23_s8, %s466_s3  ;;  %p472_p13 = scmp.lt.s32.totalorder %s466_s3, %s466_s3 }
  0x1d   :  { %p473_p0 = por %p472_p13, %p471_p12 }
  0x1f   :  { %p474_p1 = pnand %p473_p0, %p467_p11 }
  0x21   :  { %477 = shalt.err (!%p474_p1)
}
  0x22   :  { %25 = dma.hbm_to_vmem [thread:$0]  %s602_s2, 32, %s23_s8, [#allocation3]  }
  0x23   :  { %s478_s22 = scalar_lea.hbm %s604_s4, 64 }
  0x24   :  { %p479_p2 = scmp.ne.s32.totalorder %s604_s4, %s478_s22  ;;  %p482_p3 = scmp.lt.u32.totalorder %s478_s22, %s604_s4 }
  0x26   :  { %p484_p4 = pnand %p482_p3, %p479_p2 }
  0x28   :  { %487 = shalt.err (!%p484_p4)
}
  0x29   :  { %s488_s27 = scalar_lea.vmem %s45_s10, 64  ;;  %p493_p6 = scmp.lt.s32.totalorder %s45_s10, %s45_s10 }
  0x2a   :  { %p489_p5 = scmp.ne.s32.totalorder %s45_s10, %s488_s27  ;;  %p494_p7 = scmp.lt.s32.totalorder %s488_s27, %s488_s27 }
  0x2c   :  { %p495_p8 = por %p494_p7, %p493_p6 }
  0x2e   :  { %p496_p9 = pnand %p495_p8, %p489_p5 }
  0x30   :  { %499 = shalt.err (!%p496_p9)
}
  0x31   :  { %47 = dma.hbm_to_vmem [thread:$0]  %s604_s4, 64, %s45_s10, [#allocation5]  }
  0x32   :  { %500 = dma.done.wait [#allocation3], 32  }
  0x33   :  { %501 = vsyncadd [#allocation3], 4294967264 }
  0x34   :  { %502 = dma.done.wait [#allocation5], 2112  }
  0x35   :  { %503 = vsyncadd [#allocation5], 4294965184  ;;  %v509_v0 = vmov 0   ;;  %v409_v1 = vld [vmem:[%s601_s1 + $0x4] ss:$8 sps:$4 sm:$0xff]   ;;  %v422_v12 = vld [vmem:[#allocation4 + $0x50] sm:$0xff]   ;;  %v68_v25 = vlaneseq }
  0x36   :  { %144 = vmatprep.mubr.bf16.mxu0 %v509_v0  ;;  %v411_v2 = vld [vmem:[%s601_s1] ss:$8 sps:$4 sm:$0xff]   ;;  %112 = vmatprep.subr.bf16.mxu0 %v409_v1  ;;  %v412_v3 = vld [vmem:[%s601_s1 + $0x14] ss:$8 sps:$4 sm:$0xff]   ;;  %v414_v4 = vld [vmem:[%s601_s1 + $0x10] ss:$8 sps:$4 sm:$0xff]  }
  0x37   :  { %113 = vmatpush1.bf16.msra.mxu0 %v411_v2  ;;  %v415_v5 = vld [vmem:[%s601_s1 + $0x24] ss:$8 sps:$4 sm:$0xff]   ;;  %v417_v6 = vld [vmem:[%s601_s1 + $0x20] ss:$8 sps:$4 sm:$0xff]   ;;  %vm108_vm0 = vcmask 392192   ;;  %v423_v14 = vld [vmem:[#allocation4 + $0x10] sm:$0xff]  }
  0x38   :  { %114 = vmatprep.subr.bf16.mxu0 %v412_v3  ;;  %v58_v7 = vld [vmem:[%s600_s0] sm:$0x3]  ;;  %v418_v8 = vld [vmem:[#allocation4 + $0x40] sm:$0xff]   ;;  %v420_v10 = vld [vmem:[#allocation4 + $0x48] sm:$0xff]   ;;  %v69_v26 = vshrl.u32 %v68_v25, 7  ;;  %vm338_vm1 = vcmask 1041408  }
  0x39   :  { %v419_v9 = vld [vmem:[#allocation4] sm:$0xff]   ;;  %381 = vmatprep.subr.bf16.mxu1 %v418_v8  ;;  %v421_v11 = vld [vmem:[#allocation4 + $0x8] sm:$0xff]   ;;  %v59_v13 = vpack.c.bf16 %v58_v7, %v58_v7  ;;  %v424_v15 = vld [vmem:[#allocation4 + $0x58] sm:$0xff]   ;;  %vm347_vm2 = vcmask 1024  }
  0x3a   :  { %382 = vmatpush3.bf16.msra.mxu1 %v419_v9  ;;  %v425_v16 = vld [vmem:[#allocation4 + $0x18] sm:$0xff]   ;;  %v426_v17 = vld [vmem:[#allocation4 + $0x60] sm:$0xff]   ;;  %v428_v19 = vld [vmem:[#allocation4 + $0x68] sm:$0xff]   ;;  %v70_v27 = vsub.s32 0, %v69_v26  ;;  %v74_v29 = vsub.s32 1, %v69_v26 }
  0x3b   :  { %115 = vmatpush1.bf16.msra.mxu0 %v414_v4  ;;  %383 = vmatprep.subr.bf16.mxu1 %v420_v10  ;;  %v427_v18 = vld [vmem:[#allocation4 + $0x20] sm:$0xff]   ;;  %v429_v20 = vld [vmem:[#allocation4 + $0x28] sm:$0xff]   ;;  %v430_v21 = vld [vmem:[#allocation4 + $0x70] sm:$0xff]  }
  0x3c   :  { %116 = vmatprep.subr.bf16.mxu0 %v415_v5  ;;  %v431_v22 = vld [vmem:[#allocation4 + $0x30] sm:$0xff]   ;;  %v432_v23 = vld [vmem:[#allocation4 + $0x78] sm:$0xff]   ;;  %v362_v43 = vld [vmem:[#allocation6] ss:$0 sm:$0xff] }
  0x3d   :  { %v433_v24 = vld [vmem:[#allocation4 + $0x38] sm:$0xff]   ;;  %v379_v49 = vld [vmem:[#allocation6 + $0x1] ss:$0 sm:$0xff]  ;;  %v380_v53 = vld [vmem:[#allocation6 + $0x2] ss:$0 sm:$0xff] }
  0x3e   :  { %384 = vmatpush3.bf16.msra.mxu1 %v421_v11  ;;  %v66_v28 = vld [vmem:[#allocation2] sm:$0x3] }
  0x3f   :  { %117 = vmatpush1.bf16.msra.mxu0 %v417_v6  ;;  %385 = vmatprep.subr.bf16.mxu1 %v422_v12  ;;  %v71_v30 = vrot.slane %v66_v28, %v70_v27  ;;  %v75_v31 = vrot.slane %v66_v28, %v74_v29 }
  0x42   :  { %361 = vmatmul.mubr.msk.bf16.vlgmr.msra.gmra.mrb[0].mxu0 %vm108_vm0, %v59_v13  ;;  %386 = vmatpush3.bf16.msra.mxu1 %v423_v14 }
  0x43   :  { %387 = vmatprep.subr.bf16.mxu1 %v424_v15 }
  0x46   :  { %388 = vmatpush3.bf16.msra.mxu1 %v425_v16 }
  0x47   :  { %389 = vmatprep.subr.bf16.mxu1 %v426_v17 }
  0x4a   :  { %390 = vmatpush3.bf16.msra.mxu1 %v427_v18 }
  0x4b   :  { %391 = vmatprep.subr.bf16.mxu1 %v428_v19 }
  0x4e   :  { %392 = vmatpush3.bf16.msra.mxu1 %v429_v20 }
  0x4f   :  { %393 = vmatprep.subr.bf16.mxu1 %v430_v21 }
  0x52   :  { %394 = vmatpush3.bf16.msra.mxu1 %v431_v22 }
  0x53   :  { %395 = vmatprep.subr.bf16.mxu1 %v432_v23 }
  0x56   :  { %396 = vmatpush3.bf16.msra.mxu1 %v433_v24 }
 0x115   :  { %v146_v32 = vpop.f32.mrb[0].mxu0 }
 0x116   :  { %v147_v33 = vadd.f32 %v146_v32, %v71_v30  ;;  %v148_v34 = vpop.f32.mrb[1].mxu0 }
 0x117   :  { %v149_v35 = vadd.f32 %v148_v34, %v75_v31  ;;  %v150_v36 = vpop.f32.mrb[2].mxu0 }
 0x118   :  { %v153_v37 = vmax.f32 %v147_v33, 0.0  ;;  %v151_v38 = vpop.f32.mrb[3].mxu0 }
 0x119   :  { %v154_v39 = vmax.f32 %v149_v35, 0.0 }
 0x11a   :  { %v155_v41 = vpack.c.bf16 %v153_v37, %v153_v37 }
 0x11b   :  { %v156_v40 = vpack.c.bf16 %v154_v39, %v154_v39 }
 0x11d   :  { %322 = vmatprep.mubr.bf16.mxu1 %v156_v40 }
 0x11e   :  { %323 = vmatmul.mubr.bf16.vlgmr.msra.gmra.mrb[0].mxu1 %v155_v41 }
 0x1f1   :  { %v397_v42 = vpop.f32.mrb[0].mxu1 }
 0x1f2   :  { %v398_v44 = vpop.f32.mrb[1].mxu1 }
 0x1f3   :  { %v399_v45 = vadd.f32 %v398_v44, %v397_v42  ;;  %v400_v46 = vpop.f32.mrb[2].mxu1 }
 0x1f4   :  { %v401_v47 = vpop.f32.mrb[3].mxu1 }
 0x1f5   :  { %v325_v48 = vadd.f32 %v399_v45, %v362_v43 }
 0x1f7   :  { %v330_v50 = vmax.f32 %v325_v48, 0.0 }
 0x1f9   :  { %v337_v51 = vmul.f32 %v379_v49, %v330_v50 }
 0x1fb   :  { %v339_v52 = vsel %vm338_vm1, %v337_v51, 0.0 }
 0x1fc   :  { %340 = vadd.xlane.f32.xlu0 %v339_v52 }
 0x289   :  { %v341_v54 = vpop.xlane.xlu0 %340 }
 0x28a   :  { %v346_v55 = vadd.f32 %v380_v53, %v341_v54 }
 0x28c   :  { %348 = vst.msk [vmem:[%s605_s5] sm:$0x3] %vm347_vm2, %v346_v55 }
 0x28d   :  { %353 = vsyncpa [#allocation3], 1 }
 0x28e   :  { %354 = vsyncpa [#allocation5], 1 }

</bundles_post_ra>
